<compile_context>
chip_gen: v5e
topology: v5e:2x2
jax: 0.10.0
libtpu: 0.0.40
codegen_flags: <defaults>
</compile_context>

<pallas_src>
import functools

import numpy as np

import jax
import jax.numpy as jnp
from jax import lax
from jax.experimental import pallas as pl
from jax.experimental.pallas import tpu as pltpu


_LANE_CHUNK = 256  # in-kernel batch-lane chunk (multiple of 128, keeps vregs low)


def _round_up(x, m):
    return ((x + m - 1) // m) * m


def _padded_bytes(rows, cols, itemsize=4):
    """f32 VMEM footprint of a (rows, cols) buffer after (8,128) tiling."""
    return _round_up(max(rows, 1), 8) * _round_up(max(cols, 1), 128) * itemsize


def _choose_tile(batch, block_rows):
    """Pick (tile_rows, lane_chunk): big tiles, grid >= 2 when possible (v7x 2 TCs)."""
    tgt = _round_up(max(int(block_rows), 128), 128)
    cap_batch = _round_up(batch, 128)
    # Cap the tile at ~half the batch so the "parallel" grid axis has >= 2
    # steps and can shard across both TensorCores on v7x.
    cap_two = _round_up(pl.cdiv(batch, 2), 128) if batch > 128 else cap_batch
    tm = max(128, min(tgt, cap_batch, cap_two))
    chunk = min(_LANE_CHUNK, tm)
    tm = _round_up(tm, chunk)          # tile is a whole number of lane chunks
    return tm, chunk


def pack_params(params):
    """Pack the MLP parameters into ONE lane-padded f32 buffer.

    params: list of (W, b) with W: [in, out], b: [1, out]; last pair has out=1.

    Hidden layer i occupies columns [off_i, off_i + in_i + 1): [W_i^T | b_i].
    The output layer occupies a single column: rows 0..hidden-1 = w_last,
    row `hidden` = b_last.

    Returns (packed_buffer, layer_dims, col_offs) where layer_dims[i] = (in_i, out_i)
    and col_offs[i] is the column offset of layer i inside the buffer.
    """
    n_layers = len(params) - 1
    assert n_layers >= 1, "expected at least one hidden layer"

    blocks, layer_dims, col_offs = [], [], []
    col, max_rows = 0, 0
    for i, (w, b) in enumerate(params):
        w = jnp.asarray(w, jnp.float32)
        b = jnp.asarray(b, jnp.float32).reshape(-1)
        fan_in, fan_out = w.shape
        layer_dims.append((fan_in, fan_out))
        col_offs.append(col)
        if i < n_layers:
            blk = jnp.concatenate([w.T, b.reshape(fan_out, 1)], axis=1)   # (out, in+1)
            col += fan_in + 1
        else:
            assert fan_out == 1, "final layer must have a single output"
            blk = jnp.concatenate([w.reshape(fan_in, 1), b.reshape(1, 1)],
                                  axis=0)                                  # (in+1, 1)
            col += 1
        blocks.append(blk)
        max_rows = max(max_rows, blk.shape[0])

    rows = _round_up(max(max_rows, 8), 8)
    cols = _round_up(max(col, 128), 128)
    buf = jnp.zeros((rows, cols), jnp.float32)
    for blk, off in zip(blocks, col_offs):
        r, c = blk.shape
        buf = buf.at[:r, off:off + c].set(blk)
    return buf, tuple(layer_dims), tuple(col_offs)


def _cast(v, dt):
    return v if v.dtype == dt else v.astype(dt)


def _mlp_kernel(layer_dims, col_offs, chunk, compute_dtype,
                x_ref, p_ref, out_ref):
    """One batch tile of the baseline MLP.

    x_ref:   (TM, obs_dim)  observation tile (f32), batch on sublanes in HBM order.
    p_ref:   (R, C)         packed parameter buffer (f32), VMEM-resident.
    out_ref: (1, TM)        lane-dense baseline row (f32).
    """
    n_layers = len(layer_dims) - 1
    tm = x_ref.shape[0]
    n_chunks = tm // chunk
    cd = jnp.dtype(compute_dtype)

    def one_chunk(c, carry):
        start = c * chunk
        if not isinstance(start, int):
            start = pl.multiple_of(start, chunk)
        xc = x_ref[pl.ds(start, chunk), :]                       # (chunk, obs_dim) f32

        # Layer 0: contract obs_dim (last dim of both operands) so the result is
        # already lane-major (out0, chunk) -- no wrapper transpose needed.
        in0, out0 = layer_dims[0]
        off = col_offs[0]
        w = p_ref[0:out0, off:off + in0]                         # (out0, in0)
        b = p_ref[0:out0, off + in0:off + in0 + 1]               # (out0, 1)
        z = lax.dot_general(_cast(w, cd), _cast(xc, cd),
                            dimension_numbers=(((1,), (1,)), ((), ())),
                            preferred_element_type=jnp.float32)  # (out0, chunk)
        h = jnp.maximum(z + b, 0.0)

        # Remaining hidden layers: standard (out, in) @ (in, chunk) on the MXU,
        # f32 accumulation; bias-add / ReLU on the VPU in f32.
        for li in range(1, n_layers):
            ini, outi = layer_dims[li]
            off = col_offs[li]
            w = p_ref[0:outi, off:off + ini]                     # (outi, ini)
            b = p_ref[0:outi, off + ini:off + ini + 1]           # (outi, 1)
            z = jnp.dot(_cast(w, cd), _cast(h, cd),
                        preferred_element_type=jnp.float32)      # (outi, chunk)
            h = jnp.maximum(z + b, 0.0)

        # Final Linear(out_features=1): VPU multiply + cross-sublane (XLU)
        # reduce, emitted lane-dense -> full vst stores, no 1-lane MXU pass.
        hid = layer_dims[n_layers][0]
        off = col_offs[n_layers]
        wl = p_ref[0:hid, off:off + 1]                           # (hid, 1) f32
        bl = p_ref[hid:hid + 1, off:off + 1]                     # (1, 1)  f32
        res = jnp.sum(h * wl, axis=0, keepdims=True) + bl        # (1, chunk) f32
        out_ref[:, pl.ds(start, chunk)] = res.astype(out_ref.dtype)
        return carry

    lax.fori_loop(0, n_chunks, one_chunk, 0, unroll=True)


def baseline_forward(observations, packed, layer_dims, col_offs, *,
                     block_rows=4096, compute_dtype=jnp.float32):
    """Pallas forward pass of the baseline MLP (== network(obs).squeeze(1)).

    Args:
        observations: [batch, obs_dim] array (any float dtype; used as f32).
        packed / layer_dims / col_offs: output of pack_params(params).
        block_rows: target batch tile per grid step (rounded to 128 lanes).
        compute_dtype: dtype of the MXU dot operands (f32 default; bf16 casts
            happen in-kernel only -- observations/biases/accumulation stay f32).

    Returns:
        [batch] float32 baseline values.
    """
    batch, obs_dim = observations.shape
    assert obs_dim == layer_dims[0][0], "obs_dim mismatch with packed params"
    if observations.dtype != jnp.float32:
        observations = observations.astype(jnp.float32)

    tm, chunk = _choose_tile(batch, block_rows)
    grid = (pl.cdiv(batch, tm),)

    # Tight VMEM budget from the (8,128)-padded footprint (double-buffered obs
    # and out tiles + the resident packed parameter buffer) plus headroom,
    # capped well below v7x's 64 MiB per-TC VMEM.
    need = (2 * _padded_bytes(tm, obs_dim)
            + 2 * _padded_bytes(1, tm)
            + 2 * _padded_bytes(packed.shape[0], packed.shape[1]))
    vmem_limit = int(min(max(need + (6 << 20), 8 << 20), 30 << 20))

    out = pl.pallas_call(
        functools.partial(_mlp_kernel, layer_dims, col_offs, chunk, compute_dtype),
        out_shape=jax.ShapeDtypeStruct((1, batch), jnp.float32),
        grid=grid,
        in_specs=[
            # Batch-tiled observations; final partial block is clipped/masked.
            pl.BlockSpec((tm, obs_dim), lambda i: (i, 0)),
            # Packed params: constant index_map -> DMA'd once, VMEM-resident.
            pl.BlockSpec(packed.shape, lambda i: (0, 0)),
        ],
        out_specs=pl.BlockSpec((1, tm), lambda i: (0, i)),
        compiler_params=pltpu.CompilerParams(
            dimension_semantics=("parallel",),
            vmem_limit_bytes=vmem_limit,
        ),
    )(observations, packed)

    # squeeze(1) equivalent: (1, batch) -> (batch,)
    return out[0]


def init_mlp_params(key, obs_dim, layer_size, n_layers):
    """Deterministic init mimicking torch.nn.Linear default (U[-1/sqrt(fan_in), +])."""
    dims = [obs_dim] + [layer_size] * n_layers + [1]
    params = []
    for i in range(len(dims) - 1):
        fan_in, fan_out = dims[i], dims[i + 1]
        key, kw, kb = jax.random.split(key, 3)
        bound = 1.0 / jnp.sqrt(jnp.float32(fan_in))
        w = jax.random.uniform(kw, (fan_in, fan_out), jnp.float32, -bound, bound)
        b = jax.random.uniform(kb, (1, fan_out), jnp.float32, -bound, bound)
        params.append((w, b))
    return params


def reference_forward(observations, params):
    """High-precision numpy reference of the same MLP for correctness checks."""
    h = np.asarray(observations, np.float64)
    for i, (w, b) in enumerate(params):
        h = h @ np.asarray(w, np.float64) + np.asarray(b, np.float64).reshape(1, -1)
        if i < len(params) - 1:
            h = np.maximum(h, 0.0)
    return h[:, 0]


if __name__ == "__main__":
    # Config consistent with the module (CartPole-ish obs space, 2 hidden
    # layers of size 32: config['hyper_params']['n_layers'] / ['layer_size']).
    obs_dim = 4
    n_layers = 2
    layer_size = 32

    key = jax.random.PRNGKey(0)
    params = init_mlp_params(key, obs_dim, layer_size, n_layers)
    packed, layer_dims, col_offs = pack_params(params)   # pack once, reuse per call

    # --- small batch (single clipped tile, batch < 128 lanes) ----------------
    key, k_obs = jax.random.split(key)
    obs_small = jax.random.normal(k_obs, (8, obs_dim), dtype=jnp.float32)
    out_small = jax.block_until_ready(
        baseline_forward(obs_small, packed, layer_dims, col_offs))
    assert out_small.ndim == 1 and out_small.shape == (8,), out_small.shape
    ref_small = reference_forward(obs_small, params)
    assert np.allclose(np.asarray(out_small), ref_small, atol=1e-4, rtol=1e-4)

    # --- larger batch (2-step grid, non-multiple of the tile, masked tail) ---
    key, k_obs2 = jax.random.split(key)
    obs_big = jax.random.normal(k_obs2, (700, obs_dim), dtype=jnp.float32)
    out_big = jax.block_until_ready(
        baseline_forward(obs_big, packed, layer_dims, col_offs))
    assert out_big.shape == (700,), out_big.shape
    ref_big = reference_forward(obs_big, params)
    assert np.allclose(np.asarray(out_big), ref_big, atol=1e-4, rtol=1e-4)

    # --- optional bf16 MXU path (casts dot operands in-kernel only) ----------
    out_bf16 = jax.block_until_ready(
        baseline_forward(obs_big, packed, layer_dims, col_offs,
                         compute_dtype=jnp.bfloat16))
    assert out_bf16.shape == (700,)
    assert bool(jnp.all(jnp.isfinite(out_bf16)))
    assert np.allclose(np.asarray(out_bf16), ref_big, atol=5e-2, rtol=5e-2)

    print("KERNEL_OK")
</pallas_src>

<mosaic_0001>
module attributes {stable_mosaic.version = 11 : i64} {
  func.func @_mlp_kernel(%arg0: i32, %arg1: memref<128x4xf32, #tpu.memory_space<vmem>>, %arg2: memref<40x128xf32, #tpu.memory_space<vmem>>, %arg3: memref<1x128xf32, #tpu.memory_space<vmem>>) attributes {dimension_semantics = [#tpu.dimension_semantics<parallel>], iteration_bounds = array<i64: 1>, scalar_prefetch = 0 : i64, scratch_operands = 0 : i64, tpu.core_type = #tpu.core_type<tc>, window_params = [{transform_indices = @transform_0, window_bounds = array<i64: 128, 4>}, {pipeline_mode = #tpu.pipeline_mode<synchronous>, transform_indices = @transform_1, window_bounds = array<i64: 40, 128>}, {transform_indices = @transform_2, window_bounds = array<i64: 1, 128>}]} {
    %c0_i32 = arith.constant 0 : i32
    %c128_i32 = arith.constant 128 : i32
    %0 = arith.muli %c0_i32, %c128_i32 : i32
    %1 = tpu.assume_multiple %0, 128 : i32
    %2 = arith.index_cast %1 : i32 to index
    %c0 = arith.constant 0 : index
    %3 = vector.load %arg1[%2, %c0] : memref<128x4xf32, #tpu.memory_space<vmem>>, vector<128x4xf32>
    %c0_0 = arith.constant 0 : index
    %c0_1 = arith.constant 0 : index
    %4 = vector.load %arg2[%c0_0, %c0_1] : memref<40x128xf32, #tpu.memory_space<vmem>>, vector<32x4xf32>
    %c0_2 = arith.constant 0 : index
    %c4 = arith.constant 4 : index
    %5 = vector.load %arg2[%c0_2, %c4] : memref<40x128xf32, #tpu.memory_space<vmem>>, vector<32x1xf32>
    %cst = arith.constant dense<0.000000e+00> : vector<32x128xf32>
    %6 = tpu.matmul %4, %3, %cst {dimension_numbers = #tpu.dot_dimension_numbers<[1], [1], [0], [0], [0, 0, 1, 0], [], []>} : vector<32x4xf32>, vector<128x4xf32>, vector<32x128xf32> -> vector<32x128xf32>
    %7 = vector.broadcast %5 : vector<32x1xf32> to vector<32x128xf32>
    %8 = arith.addf %6, %7 : vector<32x128xf32>
    %cst_3 = arith.constant 0.000000e+00 : f32
    %9 = vector.broadcast %cst_3 : f32 to vector<32x128xf32>
    %10 = arith.maximumf %8, %9 : vector<32x128xf32>
    %c0_4 = arith.constant 0 : index
    %c5 = arith.constant 5 : index
    %11 = vector.load %arg2[%c0_4, %c5] : memref<40x128xf32, #tpu.memory_space<vmem>>, vector<32x32xf32>
    %c0_5 = arith.constant 0 : index
    %c37 = arith.constant 37 : index
    %12 = vector.load %arg2[%c0_5, %c37] : memref<40x128xf32, #tpu.memory_space<vmem>>, vector<32x1xf32>
    %cst_6 = arith.constant dense<0.000000e+00> : vector<32x128xf32>
    %13 = tpu.matmul %11, %10, %cst_6 {dimension_numbers = #tpu.dot_dimension_numbers<[1], [0], [0], [1], [0, 0, 1, 1], [], []>} : vector<32x32xf32>, vector<32x128xf32>, vector<32x128xf32> -> vector<32x128xf32>
    %14 = vector.broadcast %12 : vector<32x1xf32> to vector<32x128xf32>
    %15 = arith.addf %13, %14 : vector<32x128xf32>
    %cst_7 = arith.constant 0.000000e+00 : f32
    %16 = vector.broadcast %cst_7 : f32 to vector<32x128xf32>
    %17 = arith.maximumf %15, %16 : vector<32x128xf32>
    %c0_8 = arith.constant 0 : index
    %c38 = arith.constant 38 : index
    %18 = vector.load %arg2[%c0_8, %c38] : memref<40x128xf32, #tpu.memory_space<vmem>>, vector<32x1xf32>
    %c32 = arith.constant 32 : index
    %c38_9 = arith.constant 38 : index
    %19 = vector.load %arg2[%c32, %c38_9] : memref<40x128xf32, #tpu.memory_space<vmem>>, vector<1x1xf32>
    %20 = vector.broadcast %18 : vector<32x1xf32> to vector<32x128xf32>
    %21 = arith.mulf %17, %20 : vector<32x128xf32>
    %cst_10 = arith.constant dense<0.000000e+00> : vector<128xf32>
    %22 = vector.multi_reduction <add>, %21, %cst_10 [0] : vector<32x128xf32> to vector<128xf32>
    %23 = vector.shape_cast %22 : vector<128xf32> to vector<1x128xf32>
    %24 = vector.broadcast %19 : vector<1x1xf32> to vector<1x128xf32>
    %25 = arith.addf %23, %24 : vector<1x128xf32>
    %c0_11 = arith.constant 0 : index
    %26 = arith.index_cast %1 : i32 to index
    %27 = vector.load %arg3[%c0_11, %26] : memref<1x128xf32, #tpu.memory_space<vmem>>, vector<1x128xf32>
    tpu.vector_store %arg3[%c0_11, %26], %25 {strides = array<i32>} : memref<1x128xf32, #tpu.memory_space<vmem>>, vector<1x128xf32>,
    %c1_i32 = arith.constant 1 : i32
    return
  }
  func.func @transform_0(%arg0: i32) -> (i32, i32) {
    %c0_i32 = arith.constant 0 : i32
    %c0_i32_0 = arith.constant 0 : i32
    return %arg0, %c0_i32 : i32, i32
  }
  func.func @transform_1(%arg0: i32) -> (i32, i32) {
    %c0_i32 = arith.constant 0 : i32
    %c0_i32_0 = arith.constant 0 : i32
    %c0_i32_1 = arith.constant 0 : i32
    return %c0_i32, %c0_i32_0 : i32, i32
  }
  func.func @transform_2(%arg0: i32) -> (i32, i32) {
    %c0_i32 = arith.constant 0 : i32
    %c0_i32_0 = arith.constant 0 : i32
    return %c0_i32, %arg0 : i32, i32
  }
}

</mosaic_0001>

<bundles_post_ra>
// kernel: tpu_custom_call.1
= control target key start
LH: loop header
LB: loop body
LE: loop exit
PB: predicated region body
PF: predicated region fallthrough
CT: control target
= control target key end

     0   :  { %7 = vsyncpa [#allocation3], 0  ;;  %s545_s0 = inlined_call_operand.vmem [shape: f32[8,4], index: 0, kind: input, shape index: {}]   ;;  %s546_s1 = inlined_call_operand.hbm [shape: f32[40,128], index: 1, kind: input, shape index: {}]   ;;  %s547_s2 = inlined_call_operand.hbm [shape: f32[1,8], index: 2, kind: output, shape index: {}]  }
   0x1   :  { %8 = vsyncpa [#allocation4], 0  ;;  %s15_s11 = sshll.u32 %s546_s1, 4  ;;  %s402_s12 = smov [#allocation2]   ;;  %s16_s11 = int_to_ptr.hbm [resolvable:$true] %s15_s11 }
   0x2   :  { %s17_s13 = sshll.u32 %s402_s12, 4  ;;  %s403_s14 = smov 128   ;;  %s18_s13 = int_to_ptr.vmem [resolvable:$true] %s17_s13 }
   0x3   :  { %s404_s15 = smov 8  }
   0x4   :  { %23 = dma.hbm_to_vmem [thread:$0]  %s16_s11, 640, %s18_s13, [#allocation3], %s403_s14, %s403_s14, %s404_s15  }
   0x5   :  { %398 = dma.done.wait [#allocation3], 640  }
   0x6   :  { %399 = vsyncadd [#allocation3], 4294966656  ;;  %vm68_vm0 = vcmask 31744   ;;  %v43_v0 = vld [vmem:[%s545_s0 + $0x78] sm:$0xff]  ;;  %v42_v1 = vld [vmem:[%s545_s0 + $0x70] sm:$0xff]  ;;  %v405_v11 = vmov 4  }
   0x7   :  { %303 = vmatpush.xpose.msk.msra.mxu3 %vm68_vm0, %v43_v0  ;;  %302 = vmatpush.xpose.msk.msra.mxu2 %vm68_vm0, %v43_v0  ;;  %v41_v2 = vld [vmem:[%s545_s0 + $0x68] sm:$0xff]  ;;  %v40_v3 = vld [vmem:[%s545_s0 + $0x60] sm:$0xff]  ;;  %v39_v4 = vld [vmem:[%s545_s0 + $0x58] sm:$0xff]  ;;  %s406_s11 = smov 123   ;;  %v407_v21 = vmov 37   ;;  %v408_v23 = vmov 38  }
   0x8   :  { %278 = vmatpush.xpose.msk.msra.mxu0 %vm68_vm0, %v43_v0  ;;  %v38_v5 = vld [vmem:[%s545_s0 + $0x50] sm:$0xff]  ;;  %v37_v6 = vld [vmem:[%s545_s0 + $0x48] sm:$0xff]  ;;  %v36_v7 = vld [vmem:[%s545_s0 + $0x40] sm:$0xff]  ;;  %342 = vset.pattern.permute.xlu0 %v405_v11  ;;  %vm182_vm1 = vcmask 261120   ;;  %s268_s22 = sshll.u32 %s547_s2, 4  ;;  %s269_s22 = int_to_ptr.hbm [resolvable:$true] %s268_s22 }
   0x9   :  { %v35_v8 = vld [vmem:[%s545_s0 + $0x38] sm:$0xff]  ;;  %v34_v10 = vld [vmem:[%s545_s0 + $0x30] sm:$0xff]  ;;  %v487_v12 = vld [vmem:[#allocation2 + $0x8] sm:$0xff]  ;;  %343 = vset.pattern.permute.xlu1 %v405_v11  ;;  %344 = vset.pattern.permute.xlu2 %v407_v21 }
   0xa   :  { %v479_v9 = vld [vmem:[#allocation2 + $0x18] sm:$0xff]  ;;  %55 = vperm.xlu1 %343, %v487_v12   ;;  %v33_v13 = vld [vmem:[%s545_s0 + $0x28] sm:$0xff]  ;;  %v44_v14 = vld [vmem:[#allocation2] sm:$0xff] }
   0xb   :  { %305 = vmatpush.xpose.msk.msra.mxu3 %vm68_vm0, %v42_v1  ;;  %304 = vmatpush.xpose.msk.msra.mxu2 %vm68_vm0, %v42_v1  ;;  %v32_v15 = vld [vmem:[%s545_s0 + $0x20] sm:$0xff]  ;;  %v46_v16 = vld [vmem:[#allocation2 + $0x10] sm:$0xff]  ;;  %v31_v17 = vld [vmem:[%s545_s0 + $0x18] sm:$0xff] }
   0xc   :  { %279 = vmatpush.xpose.msk.msra.mxu0 %vm68_vm0, %v42_v1  ;;  %65 = vperm.xlu0 %342, %v479_v9   ;;  %v30_v18 = vld [vmem:[%s545_s0 + $0x10] sm:$0xff]  ;;  %v29_v19 = vld [vmem:[%s545_s0 + $0x8] sm:$0xff]  ;;  %v28_v20 = vld [vmem:[%s545_s0] sm:$0xff]  ;;  %s409_s0 = smov [#allocation5]  }
   0xd   :  { %174 = vrot.lane.b32.xlu2 %v44_v14, %s406_s11  ;;  %v224_v37 = vld [vmem:[#allocation2 + $0x20] sm:$0x1]  ;;  %s266_s19 = sshll.u32 %s409_s0, 4  ;;  %s267_s19 = int_to_ptr.vmem [resolvable:$true] %s266_s19 }
   0xf   :  { %307 = vmatpush.xpose.msk.msra.mxu3 %vm68_vm0, %v41_v2  ;;  %306 = vmatpush.xpose.msk.msra.mxu2 %vm68_vm0, %v41_v2 }
  0x10   :  { %280 = vmatpush.xpose.msk.msra.mxu0 %vm68_vm0, %v41_v2 }
  0x12   :  { %50 = vperm.xlu1 %343, %v44_v14  }
  0x13   :  { %309 = vmatpush.xpose.msk.msra.mxu3 %vm68_vm0, %v40_v3  ;;  %308 = vmatpush.xpose.msk.msra.mxu2 %vm68_vm0, %v40_v3 }
  0x14   :  { %281 = vmatpush.xpose.msk.msra.mxu0 %vm68_vm0, %v40_v3  ;;  %60 = vperm.xlu0 %342, %v46_v16  }
  0x15   :  { %176 = vrot.lane.b32.xlu2 %v487_v12, %s406_s11 }
  0x17   :  { %311 = vmatpush.xpose.msk.msra.mxu3 %vm68_vm0, %v39_v4  ;;  %310 = vmatpush.xpose.msk.msra.mxu2 %vm68_vm0, %v39_v4 }
  0x18   :  { %282 = vmatpush.xpose.msk.msra.mxu0 %vm68_vm0, %v39_v4 }
  0x1a   :  { %180 = vrot.lane.b32.xlu1 %v479_v9, %s406_s11 }
  0x1b   :  { %313 = vmatpush.xpose.msk.msra.mxu3 %vm68_vm0, %v38_v5  ;;  %312 = vmatpush.xpose.msk.msra.mxu2 %vm68_vm0, %v38_v5 }
  0x1c   :  { %283 = vmatpush.xpose.msk.msra.mxu0 %vm68_vm0, %v38_v5  ;;  %178 = vrot.lane.b32.xlu0 %v46_v16, %s406_s11 }
  0x1d   :  { %346 = vset.pattern.permute.xlu1 %v407_v21  ;;  %345 = vset.pattern.permute.xlu0 %v407_v21 }
  0x1e   :  { %159 = vperm.xlu2 %344, %v44_v14  }
  0x1f   :  { %315 = vmatpush.xpose.msk.msra.mxu3 %vm68_vm0, %v37_v6  ;;  %314 = vmatpush.xpose.msk.msra.mxu2 %vm68_vm0, %v37_v6 }
  0x20   :  { %284 = vmatpush.xpose.msk.msra.mxu0 %vm68_vm0, %v37_v6 }
  0x22   :  { %167 = vperm.xlu1 %346, %v46_v16  }
  0x23   :  { %317 = vmatpush.xpose.msk.msra.mxu3 %vm68_vm0, %v36_v7  ;;  %316 = vmatpush.xpose.msk.msra.mxu2 %vm68_vm0, %v36_v7 }
  0x24   :  { %285 = vmatpush.xpose.msk.msra.mxu0 %vm68_vm0, %v36_v7  ;;  %163 = vperm.xlu0 %345, %v487_v12  }
  0x26   :  { %171 = vperm.xlu2 %344, %v479_v9  }
  0x27   :  { %319 = vmatpush.xpose.msk.msra.mxu3 %vm68_vm0, %v35_v8  ;;  %318 = vmatpush.xpose.msk.msra.mxu2 %vm68_vm0, %v35_v8 }
  0x28   :  { %286 = vmatpush.xpose.msk.msra.mxu0 %vm68_vm0, %v35_v8 }
  0x2a   :  { %347 = vset.pattern.permute.xlu1 %v408_v23 }
  0x2b   :  { %321 = vmatpush.xpose.msk.msra.mxu3 %vm68_vm0, %v34_v10  ;;  %320 = vmatpush.xpose.msk.msra.mxu2 %vm68_vm0, %v34_v10 }
  0x2c   :  { %287 = vmatpush.xpose.msk.msra.mxu0 %vm68_vm0, %v34_v10  ;;  %349 = vset.pattern.permute.xlu0 %v408_v23 }
  0x2d   :  { %226 = vperm.xlu1 %347, %v44_v14   ;;  %234 = vperm.xlu0 %349, %v46_v16  }
  0x2e   :  { %348 = vset.pattern.permute.xlu2 %v408_v23 }
  0x2f   :  { %323 = vmatpush.xpose.msk.msra.mxu3 %vm68_vm0, %v33_v13  ;;  %322 = vmatpush.xpose.msk.msra.mxu2 %vm68_vm0, %v33_v13 }
  0x30   :  { %288 = vmatpush.xpose.msk.msra.mxu0 %vm68_vm0, %v33_v13  ;;  %230 = vperm.xlu2 %348, %v487_v12  }
  0x33   :  { %325 = vmatpush.xpose.msk.msra.mxu3 %vm68_vm0, %v32_v15  ;;  %324 = vmatpush.xpose.msk.msra.mxu2 %vm68_vm0, %v32_v15 }
  0x34   :  { %289 = vmatpush.xpose.msk.msra.mxu0 %vm68_vm0, %v32_v15 }
  0x35   :  { %238 = vperm.xlu1 %347, %v479_v9  }
  0x37   :  { %327 = vmatpush.xpose.msk.msra.mxu3 %vm68_vm0, %v31_v17  ;;  %326 = vmatpush.xpose.msk.msra.mxu2 %vm68_vm0, %v31_v17 }
  0x38   :  { %290 = vmatpush.xpose.msk.msra.mxu0 %vm68_vm0, %v31_v17  ;;  %256 = vperm.xlu2 %348, %v224_v37  }
  0x3b   :  { %329 = vmatpush.xpose.msk.msra.mxu3 %vm68_vm0, %v30_v18  ;;  %328 = vmatpush.xpose.msk.msra.mxu2 %vm68_vm0, %v30_v18 }
  0x3c   :  { %291 = vmatpush.xpose.msk.msra.mxu0 %vm68_vm0, %v30_v18 }
  0x3f   :  { %331 = vmatpush.xpose.msk.msra.mxu3 %vm68_vm0, %v29_v19  ;;  %330 = vmatpush.xpose.msk.msra.mxu2 %vm68_vm0, %v29_v19 }
  0x40   :  { %292 = vmatpush.xpose.msk.msra.mxu0 %vm68_vm0, %v29_v19 }
  0x43   :  { %333 = vmatpush.xpose.msk.msra.mxu3 %vm68_vm0, %v28_v20  ;;  %332 = vmatpush.xpose.msk.msra.mxu2 %vm68_vm0, %v28_v20 }
  0x44   :  { %293 = vmatpush.xpose.msk.msra.mxu0 %vm68_vm0, %v28_v20 }
  0x46   :  { %296 = vmatmul.msk.f32.vlgmr.msra.gmra.mxu3 %vm68_vm0, %v46_v16  ;;  %295 = vmatmul.msk.f32.vlgmr.msra.gmra.mxu2 %vm68_vm0, %v487_v12 }
  0x47   :  { %294 = vmatmul.msk.f32.vlgmr.msra.gmra.mxu0 %vm68_vm0, %v44_v14 }
  0x4e   :  { %297 = vmatmul.msk.f32.gmra.mxu3 %vm68_vm0, %v479_v9 }
  0x67   :  { %v175_v39 = vpop.permute.xlu2 %174 }
  0x6f   :  { %v177_v41 = vpop.permute.xlu2 %176 }
  0x78   :  { %v160_v44 = vpop.permute.xlu2 %159 }
  0x7c   :  { %v56_v24 = vpop.permute.xlu1 %55 }
  0x7e   :  { %v66_v22 = vpop.permute.xlu0 %65 }
  0x80   :  { %v172_v48 = vpop.permute.xlu2 %171 }
  0x84   :  { %v51_v31 = vpop.permute.xlu1 %50 }
  0x86   :  { %v61_v26 = vpop.permute.xlu0 %60 }
  0x8a   :  { %v231_v56 = vpop.permute.xlu2 %230 }
  0x8c   :  { %v181_v43 = vpop.permute.xlu1 %180 }
  0x8e   :  { %v179_v42 = vpop.permute.xlu0 %178 }
  0x92   :  { %v257_v13 = vpop.permute.xlu2 %256 }
  0x94   :  { %v168_v47 = vpop.permute.xlu1 %167 }
  0x96   :  { %v164_v49 = vpop.permute.xlu0 %163 }
  0x9f   :  { %v227_v55 = vpop.permute.xlu1 %226  ;;  %v235_v59 = vpop.permute.xlu0 %234 }
  0xa7   :  { %v239_v3 = vpop.permute.xlu1 %238 }
  0xc4   :  { %v142_v32 = vpop.f32.mrf.mxu0 }
  0xc5   :  { %v143_v36 = vadd.f32 %v142_v32, %v51_v31 }
  0xc7   :  { %v154_v40 = vmax.f32 %v143_v36, 0.0 }
  0xc9   :  { %v148_v25 = vpop.f32.mrf.mxu3  ;;  %v145_v27 = vpop.f32.mrf.mxu2 }
  0xca   :  { %v149_v29 = vadd.f32 %v148_v25, %v61_v26  ;;  %v146_v33 = vadd.f32 %v145_v27, %v56_v24 }
  0xcc   :  { %v156_v35 = vmax.f32 %v149_v29, 0.0  ;;  %v155_v38 = vmax.f32 %v146_v33, 0.0 }
  0xd1   :  { %v151_v28 = vpop.f32.mrf.mxu3 }
  0xd2   :  { %v152_v30 = vadd.f32 %v151_v28, %v66_v22 }
  0xd4   :  { %v157_v34 = vmax.f32 %v152_v30, 0.0 }
  0xd6   :  { %203 = vmatpush.msra.mxu1 %v157_v34 }
  0xd8   :  { %204 = vmatpush.msra.mxu1 %v156_v35 }
  0xda   :  { %205 = vmatpush.msra.mxu1 %v155_v38 }
  0xdc   :  { %206 = vmatpush.msra.mxu1 %v154_v40 }
  0xdd   :  { %298 = vmatmul.msk.f32.vlgmr.msra.gmra.mxu1 %vm182_vm1, %v175_v39 }
  0xe5   :  { %299 = vmatmul.msk.f32.gmra.mxu1 %vm182_vm1, %v177_v41 }
  0xed   :  { %300 = vmatmul.msk.f32.gmra.mxu1 %vm182_vm1, %v179_v42 }
  0xf5   :  { %301 = vmatmul.msk.f32.gmra.mxu1 %vm182_vm1, %v181_v43 }
 0x15a   :  { %v208_v45 = vpop.f32.mrf.mxu1 }
 0x15b   :  { %v209_v52 = vadd.f32 %v208_v45, %v160_v44 }
 0x15d   :  { %v220_v57 = vmax.f32 %v209_v52, 0.0 }
 0x15f   :  { %v241_v62 = vmul.f32 %v227_v55, %v220_v57 }
 0x162   :  { %v211_v46 = vpop.f32.mrf.mxu1 }
 0x163   :  { %v212_v50 = vadd.f32 %v211_v46, %v164_v49 }
 0x165   :  { %v221_v54 = vmax.f32 %v212_v50, 0.0 }
 0x167   :  { %v242_v60 = vmul.f32 %v231_v56, %v221_v54 }
 0x169   :  { %v245_v1 = vadd.f32 %v242_v60, %v241_v62 }
 0x16a   :  { %v214_v51 = vpop.f32.mrf.mxu1 }
 0x16b   :  { %v215_v53 = vadd.f32 %v214_v51, %v168_v47 }
 0x16d   :  { %v222_v58 = vmax.f32 %v215_v53, 0.0 }
 0x16f   :  { %v243_v63 = vmul.f32 %v235_v59, %v222_v58 }
 0x171   :  { %v246_v4 = vadd.f32 %v245_v1, %v243_v63 }
 0x172   :  { %v217_v61 = vpop.f32.mrf.mxu1 }
 0x173   :  { %v218_v0 = vadd.f32 %v217_v61, %v172_v48 }
 0x175   :  { %v223_v2 = vmax.f32 %v218_v0, 0.0 }
 0x177   :  { %v244_v5 = vmul.f32 %v239_v3, %v223_v2 }
 0x179   :  { %v247_v6 = vadd.f32 %v246_v4, %v244_v5 }
 0x17b   :  { %v248_v7 = vrot.slane %v247_v6, 4 }
 0x17d   :  { %v249_v8 = vadd.f32 %v248_v7, %v247_v6 }
 0x17f   :  { %v250_v9 = vrot.slane %v249_v8, 2 }
 0x181   :  { %v251_v10 = vadd.f32 %v250_v9, %v249_v8 }
 0x183   :  { %v252_v11 = vrot.slane %v251_v10, 1 }
 0x185   :  { %v253_v12 = vadd.f32 %v252_v11, %v251_v10 }
 0x187   :  { %v259_v14 = vadd.f32 %v257_v13, %v253_v12 }
 0x189   :  { %260 = vst [vmem:[#allocation5] sm:$0x1] %v259_v14 }
 0x18a   :  { %271 = dma.vmem_to_hbm [thread:$0]  %s267_s19, 16, %s269_s22, [#allocation4]  }
 0x18b   :  { %400 = dma.done.wait [#allocation4], 16  }
 0x18c   :  { %401 = vsyncadd [#allocation4], 4294967280 }
 0x18d   :  { %276 = vsyncpa [#allocation3], 1 }
 0x18e   :  { %277 = vsyncpa [#allocation4], 1 }

</bundles_post_ra>
